<compile_context>
chip_gen: v7x
topology: tpu7x:2x2x1
jax: 0.10.0
libtpu: 0.0.40
codegen_flags: <defaults>
</compile_context>

<pallas_src>
import jax
import jax.numpy as jnp
from jax.experimental import pallas as pl
from jax.experimental.pallas import tpu as pltpu


def _lal_kernel(x_ref, wt_ref, b_ref, o_ref):
    # x_ref: (1, C, T)   wt_ref: (3, C, C)   b_ref: (3, C, 1)   o_ref: (1, C, T)
    mm_dtype = x_ref.dtype
    h = x_ref[0]                                                      # (C, T)
    h = jnp.maximum(
        jnp.dot(wt_ref[0], h, preferred_element_type=jnp.float32) + b_ref[0], 0.0)
    h = jnp.maximum(
        jnp.dot(wt_ref[1], h.astype(mm_dtype),
                preferred_element_type=jnp.float32) + b_ref[1], 0.0)
    h = jnp.dot(wt_ref[2], h.astype(mm_dtype),
                preferred_element_type=jnp.float32) + b_ref[2]
    o_ref[0] = h.astype(o_ref.dtype)


def _fold_bn(w, b, gamma, beta, mean, var, eps=1e-5):
    """Fold eval-mode BatchNorm2d into a 1x1 conv.

    w: (Cout, Cin) conv weight (torch weight[:, :, 0, 0]), b: (Cout,) bias.
    Returns effective (Cout, Cin) weight and (Cout,) bias.
    """
    scale = gamma / jnp.sqrt(var + eps)                 # (Cout,)
    w_eff = w * scale[:, None]
    b_eff = b * scale + (beta - mean * scale)
    return w_eff, b_eff


def location_adaptive_learner(x_nchw, params, nclass, *,
                              max_tile_hw=8192, compute_dtype=jnp.float32):
    """x_nchw: (N, Cin, H, W) f32.  Returns (N, nclass, Cout//nclass, H, W)."""
    N, Cin, H, W = x_nchw.shape
    (w1, b1), (w2, b2), (w3, b3) = params               # w_k: (Cout_k, Cin_k)
    Cout = w3.shape[0]

    # Common channel count over ALL six layer dims (sublane-aligned; 16 for
    # bf16 packing). Do NOT pad to 128: memory-bound, padding only adds bytes.
    align = 8 if jnp.dtype(compute_dtype).itemsize == 4 else 16
    c_max = max(Cin, w1.shape[0], w1.shape[1],
                w2.shape[0], w2.shape[1], w3.shape[0], w3.shape[1])
    C = ((c_max + align - 1) // align) * align

    def pad_w(w):
        co, ci = w.shape
        return jnp.zeros((C, C), jnp.float32).at[:co, :ci].set(w)

    def pad_b(b):
        return jnp.zeros((C, 1), jnp.float32).at[: b.shape[0], 0].set(b)

    wt_stack = jnp.stack([pad_w(w1), pad_w(w2), pad_w(w3)]).astype(compute_dtype)
    b_stack = jnp.stack([pad_b(b1), pad_b(b2), pad_b(b3)]).astype(compute_dtype)

    # Spatial axis on lanes; large multiple-of-128 tiles, grid overcovers any
    # ragged remainder (masked last-tile stores) -> no HW-axis jnp.pad copy.
    HW = H * W
    hw_lanes = max(128, ((HW + 127) // 128) * 128)
    tile_hw = min(max_tile_hw, hw_lanes)
    n_hw_tiles = pl.cdiv(HW, tile_hw)
    # v7x megacore: guarantee >= 2 parallel grid steps when a single image fits
    # in one tile, so both TensorCores get work. No effect on v5e/v6e.
    if N == 1 and n_hw_tiles == 1 and tile_hw > 128 and HW > 128:
        tile_hw = max(128, ((tile_hw // 2 + 127) // 128) * 128)
        n_hw_tiles = pl.cdiv(HW, tile_hw)

    x_flat = x_nchw.reshape(N, Cin, HW)                 # reshape only, no transpose
    if C != Cin:
        # Channel zero-pad must stay: garbage pad channels x zero weights would
        # still contaminate valid output rows (0 * NaN = NaN).
        x_flat = jnp.pad(x_flat, ((0, 0), (0, C - Cin), (0, 0)))
    x_flat = x_flat.astype(compute_dtype)

    itemsize = jnp.dtype(compute_dtype).itemsize
    cost = pl.CostEstimate(
        flops=2 * 3 * C * C * HW * N,
        transcendentals=0,
        bytes_accessed=2 * N * C * HW * itemsize + (3 * C * C + 3 * C) * itemsize,
    )

    grid = (N, n_hw_tiles)
    out = pl.pallas_call(
        _lal_kernel,
        out_shape=jax.ShapeDtypeStruct((N, C, HW), compute_dtype),
        grid_spec=pltpu.PrefetchScalarGridSpec(
            num_scalar_prefetch=0,
            grid=grid,
            in_specs=[
                pl.BlockSpec((1, C, tile_hw), lambda n, j: (n, 0, j)),  # x tile
                pl.BlockSpec((3, C, C), lambda n, j: (0, 0, 0)),        # resident W_eff
                pl.BlockSpec((3, C, 1), lambda n, j: (0, 0, 0)),        # resident b_eff
            ],
            out_specs=pl.BlockSpec((1, C, tile_hw), lambda n, j: (n, 0, j)),
        ),
        compiler_params=pltpu.CompilerParams(
            dimension_semantics=("parallel", "parallel"),
        ),
        cost_estimate=cost,
    )(x_flat, wt_stack, b_stack)

    if C != Cout:
        out = out[:, :Cout, :]                          # drop channel padding only
    # (N, Cout, H*W) -> (N, nclass, Cout//nclass, H, W): pure reshape, matches
    # torch's x.view(x.size(0), nclass, -1, H, W) on NCHW.
    return out.reshape(N, nclass, Cout // nclass, H, W)


def _make_params(key, in_channels, out_channels):
    """Deterministic synthetic conv + BN params, BN folded in (eval mode)."""
    keys = jax.random.split(key, 12)
    params = []
    cin = in_channels
    for layer in range(3):
        k_w, k_b, k_g, k_bn = keys[4 * layer: 4 * layer + 4]
        w = 0.1 * jax.random.normal(k_w, (out_channels, cin), jnp.float32)
        b = 0.1 * jax.random.normal(k_b, (out_channels,), jnp.float32)
        gamma = 1.0 + 0.05 * jax.random.normal(k_g, (out_channels,), jnp.float32)
        beta = 0.05 * jax.random.normal(k_bn, (out_channels,), jnp.float32)
        mean = 0.01 * jnp.arange(out_channels, dtype=jnp.float32)
        var = 1.0 + 0.01 * jnp.arange(out_channels, dtype=jnp.float32)
        params.append(_fold_bn(w, b, gamma, beta, mean, var))
        cin = out_channels
    return params


if __name__ == "__main__":
    # Small shapes consistent with the module (DFF-style: in/out = nclass * 4)
    nclass = 4
    in_channels = nclass * 4      # 16
    out_channels = nclass * 4     # 16
    N, H, W = 2, 16, 16

    key = jax.random.PRNGKey(0)
    k_x, k_p = jax.random.split(key)
    x = jax.random.normal(k_x, (N, in_channels, H, W), jnp.float32)
    params = _make_params(k_p, in_channels, out_channels)

    # f32 path (default): bit-accurate against the pure-JAX reference.
    out = location_adaptive_learner(x, params, nclass)
    out = jax.block_until_ready(out)

    # Pure-JAX reference of the fused conv/BN/ReLU chain (pixel-major path,
    # independent of the kernel's channels-on-sublanes layout).
    (w1, b1), (w2, b2), (w3, b3) = params
    xf = jnp.transpose(x, (0, 2, 3, 1)).reshape(-1, in_channels)
    r = jnp.maximum(xf @ w1.T + b1, 0.0)
    r = jnp.maximum(r @ w2.T + b2, 0.0)
    r = r @ w3.T + b3
    ref = r.reshape(N, H, W, out_channels).transpose(0, 3, 1, 2)
    ref = ref.reshape(N, nclass, out_channels // nclass, H, W)

    assert out.shape == (N, nclass, out_channels // nclass, H, W)
    assert jnp.allclose(out, ref, atol=1e-5, rtol=1e-5)

    # bf16 streaming path: halves HBM traffic for this memory-bound kernel
    # (f32 accumulation inside the matmuls). Looser tolerance by construction.
    out_bf16 = location_adaptive_learner(x, params, nclass,
                                         compute_dtype=jnp.bfloat16)
    out_bf16 = jax.block_until_ready(out_bf16)
    assert out_bf16.shape == out.shape
    assert jnp.allclose(out_bf16.astype(jnp.float32), ref, atol=1e-1, rtol=1e-1)

    print("KERNEL_OK")
</pallas_src>

<mosaic_0001>
module attributes {stable_mosaic.version = 11 : i64} {
  func.func @_lal_kernel(%arg0: i32, %arg1: i32, %arg2: memref<1x16x256xf32, #tpu.memory_space<vmem>>, %arg3: memref<3x16x16xf32, #tpu.memory_space<vmem>>, %arg4: memref<3x16x1xf32, #tpu.memory_space<vmem>>, %arg5: memref<1x16x256xf32, #tpu.memory_space<vmem>>) attributes {dimension_semantics = [#tpu.dimension_semantics<parallel>, #tpu.dimension_semantics<parallel>], iteration_bounds = array<i64: 2, 1>, scalar_prefetch = 0 : i64, scratch_operands = 0 : i64, tpu.core_type = #tpu.core_type<tc>, window_params = [{transform_indices = @transform_0, window_bounds = array<i64: 1, 16, 256>}, {pipeline_mode = #tpu.pipeline_mode<synchronous>, transform_indices = @transform_1, window_bounds = array<i64: 3, 16, 16>}, {pipeline_mode = #tpu.pipeline_mode<synchronous>, transform_indices = @transform_2, window_bounds = array<i64: 3, 16, 1>}, {transform_indices = @transform_3, window_bounds = array<i64: 1, 16, 256>}]} {
    %c0 = arith.constant 0 : index
    %c0_0 = arith.constant 0 : index
    %c0_1 = arith.constant 0 : index
    %0 = vector.load %arg2[%c0, %c0_0, %c0_1] : memref<1x16x256xf32, #tpu.memory_space<vmem>>, vector<1x16x256xf32>
    %1 = vector.shape_cast %0 : vector<1x16x256xf32> to vector<16x256xf32>
    %c0_2 = arith.constant 0 : index
    %c0_3 = arith.constant 0 : index
    %c0_4 = arith.constant 0 : index
    %2 = vector.load %arg3[%c0_2, %c0_3, %c0_4] : memref<3x16x16xf32, #tpu.memory_space<vmem>>, vector<1x16x16xf32>
    %3 = vector.shape_cast %2 : vector<1x16x16xf32> to vector<16x16xf32>
    %cst = arith.constant dense<0.000000e+00> : vector<16x256xf32>
    %4 = tpu.matmul %3, %1, %cst {dimension_numbers = #tpu.dot_dimension_numbers<[1], [0], [0], [1], [0, 0, 1, 1], [], []>} : vector<16x16xf32>, vector<16x256xf32>, vector<16x256xf32> -> vector<16x256xf32>
    %c0_5 = arith.constant 0 : index
    %c0_6 = arith.constant 0 : index
    %c0_7 = arith.constant 0 : index
    %5 = vector.load %arg4[%c0_5, %c0_6, %c0_7] : memref<3x16x1xf32, #tpu.memory_space<vmem>>, vector<1x16x1xf32>
    %6 = vector.shape_cast %5 : vector<1x16x1xf32> to vector<16x1xf32>
    %7 = vector.broadcast %6 : vector<16x1xf32> to vector<16x256xf32>
    %8 = arith.addf %4, %7 : vector<16x256xf32>
    %cst_8 = arith.constant 0.000000e+00 : f32
    %9 = vector.broadcast %cst_8 : f32 to vector<16x256xf32>
    %10 = arith.maximumf %8, %9 : vector<16x256xf32>
    %c1 = arith.constant 1 : index
    %c0_9 = arith.constant 0 : index
    %c0_10 = arith.constant 0 : index
    %11 = vector.load %arg3[%c1, %c0_9, %c0_10] : memref<3x16x16xf32, #tpu.memory_space<vmem>>, vector<1x16x16xf32>
    %12 = vector.shape_cast %11 : vector<1x16x16xf32> to vector<16x16xf32>
    %cst_11 = arith.constant dense<0.000000e+00> : vector<16x256xf32>
    %13 = tpu.matmul %12, %10, %cst_11 {dimension_numbers = #tpu.dot_dimension_numbers<[1], [0], [0], [1], [0, 0, 1, 1], [], []>} : vector<16x16xf32>, vector<16x256xf32>, vector<16x256xf32> -> vector<16x256xf32>
    %c1_12 = arith.constant 1 : index
    %c0_13 = arith.constant 0 : index
    %c0_14 = arith.constant 0 : index
    %14 = vector.load %arg4[%c1_12, %c0_13, %c0_14] : memref<3x16x1xf32, #tpu.memory_space<vmem>>, vector<1x16x1xf32>
    %15 = vector.shape_cast %14 : vector<1x16x1xf32> to vector<16x1xf32>
    %16 = vector.broadcast %15 : vector<16x1xf32> to vector<16x256xf32>
    %17 = arith.addf %13, %16 : vector<16x256xf32>
    %cst_15 = arith.constant 0.000000e+00 : f32
    %18 = vector.broadcast %cst_15 : f32 to vector<16x256xf32>
    %19 = arith.maximumf %17, %18 : vector<16x256xf32>
    %c2 = arith.constant 2 : index
    %c0_16 = arith.constant 0 : index
    %c0_17 = arith.constant 0 : index
    %20 = vector.load %arg3[%c2, %c0_16, %c0_17] : memref<3x16x16xf32, #tpu.memory_space<vmem>>, vector<1x16x16xf32>
    %21 = vector.shape_cast %20 : vector<1x16x16xf32> to vector<16x16xf32>
    %cst_18 = arith.constant dense<0.000000e+00> : vector<16x256xf32>
    %22 = tpu.matmul %21, %19, %cst_18 {dimension_numbers = #tpu.dot_dimension_numbers<[1], [0], [0], [1], [0, 0, 1, 1], [], []>} : vector<16x16xf32>, vector<16x256xf32>, vector<16x256xf32> -> vector<16x256xf32>
    %c2_19 = arith.constant 2 : index
    %c0_20 = arith.constant 0 : index
    %c0_21 = arith.constant 0 : index
    %23 = vector.load %arg4[%c2_19, %c0_20, %c0_21] : memref<3x16x1xf32, #tpu.memory_space<vmem>>, vector<1x16x1xf32>
    %24 = vector.shape_cast %23 : vector<1x16x1xf32> to vector<16x1xf32>
    %25 = vector.broadcast %24 : vector<16x1xf32> to vector<16x256xf32>
    %26 = arith.addf %22, %25 : vector<16x256xf32>
    %c0_22 = arith.constant 0 : index
    %c0_23 = arith.constant 0 : index
    %c0_24 = arith.constant 0 : index
    %27 = vector.load %arg5[%c0_22, %c0_23, %c0_24] : memref<1x16x256xf32, #tpu.memory_space<vmem>>, vector<1x16x256xf32>
    %28 = vector.shape_cast %27 : vector<1x16x256xf32> to vector<16x256xf32>
    %29 = vector.shape_cast %26 : vector<16x256xf32> to vector<1x16x256xf32>
    tpu.vector_store %arg5[%c0_22, %c0_23, %c0_24], %29 {strides = array<i32>} : memref<1x16x256xf32, #tpu.memory_space<vmem>>, vector<1x16x256xf32>,
    return
  }
  func.func @transform_0(%arg0: i32, %arg1: i32) -> (i32, i32, i32) {
    %c0_i32 = arith.constant 0 : i32
    %c0_i32_0 = arith.constant 0 : i32
    return %arg0, %c0_i32, %arg1 : i32, i32, i32
  }
  func.func @transform_1(%arg0: i32, %arg1: i32) -> (i32, i32, i32) {
    %c0_i32 = arith.constant 0 : i32
    %c0_i32_0 = arith.constant 0 : i32
    %c0_i32_1 = arith.constant 0 : i32
    %c0_i32_2 = arith.constant 0 : i32
    return %c0_i32, %c0_i32_0, %c0_i32_1 : i32, i32, i32
  }
  func.func @transform_2(%arg0: i32, %arg1: i32) -> (i32, i32, i32) {
    %c0_i32 = arith.constant 0 : i32
    %c0_i32_0 = arith.constant 0 : i32
    %c0_i32_1 = arith.constant 0 : i32
    %c0_i32_2 = arith.constant 0 : i32
    return %c0_i32, %c0_i32_0, %c0_i32_1 : i32, i32, i32
  }
  func.func @transform_3(%arg0: i32, %arg1: i32) -> (i32, i32, i32) {
    %c0_i32 = arith.constant 0 : i32
    %c0_i32_0 = arith.constant 0 : i32
    return %arg0, %c0_i32, %arg1 : i32, i32, i32
  }
}

</mosaic_0001>

<bundles_post_ra>
// kernel: tpu_custom_call.1
= control target key start
LH: loop header
LB: loop body
LE: loop exit
PB: predicated region body
PF: predicated region fallthrough
CT: control target
= control target key end

     0   :  { %8 = vsyncpa [#allocation3], 0  ;;  %s1108_s0 = inlined_call_operand.hbm [shape: f32[2,16,256], index: 0, kind: input, shape index: {}]   ;;  %s1109_s1 = inlined_call_operand.vmem [shape: f32[3,16,16], index: 1, kind: input, shape index: {}]   ;;  %s1110_s2 = inlined_call_operand.vmem [shape: f32[3,16,1], index: 2, kind: input, shape index: {}]   ;;  %s1111_s3 = inlined_call_operand.hbm [shape: f32[2,16,256], index: 3, kind: output, shape index: {}]  }
   0x1   :  { %10 = vsyncpa [#allocation3 + $0x1], 0 }
   0x2   :  { %11 = vsyncpa [#allocation4], 0 }
   0x3   :  { %13 = vsyncpa [#allocation4 + $0x1], 0  ;;  %s881_s12 = smov 0   ;;  %s883_s13 = smov 0  }
   0x4   :  { %s885_s14 = smov 0   ;;  %s887_s15 = smov 0  }
   0x5   :  { %s889_s16 = smov 0   ;;  %s891_s17 = smov 0  }
   0x6 LB: > { %s624_s18 = sadd.s32 4294967295, %s851_s17   ;;  %s625_s19 = sadd.s32 4294967294, %s851_s17   ;;  %s851_s17 = sphi %s891_s17, %s19_s17   ;;  %s847_s16 = sphi %s889_s16, %s1126_s16   ;;  %s843_s15 = sphi %s887_s15, %s1125_s15   ;;  %s839_s14 = sphi %s885_s14, %s1124_s14   ;;  %s835_s13 = sphi %s883_s13, %s1123_s13   ;;  %s831_s12 = sphi %s881_s12, %s1122_s12  }
   0x7   : > { %s31_s20 = sadd.s32 1, %s847_s16  ;;  %s40_s21 = sadd.s32 1, %s839_s14 }
   0x8   : > { %p33_p0 = scmp.ge.s32.totalorder %s31_s20, 2  ;;  %p47_p1 = scmp.ne.s32.totalorder %s839_s14, %s835_s13 }
   0x9   : > { %p48_p2 = scmp.eq.s32.totalorder %s851_s17, 0  ;;  %p53_p3 = scmp.ne.s32.totalorder %s835_s13, %s831_s12 }
   0xa   : > { %s1128_s20 = smov (%p33_p0, %s31_s20), 0  ;;  %p54_p5 = scmp.eq.s32.totalorder %s624_s18, 0 }
   0xb   : > { %p922_p4 = por %p48_p2, %p47_p1  ;;  %s35_s23 = ssub.s32 %s847_s16, %s1128_s20 }
   0xc   : > { %p121_p6 = scmp.eq.s32.totalorder %s624_s18, 1  ;;  %p38_p7 = scmp.eq.s32.totalorder %s35_s23, 0 }
   0xd   : > { %p928_p8 = por %p54_p5, %p53_p3  ;;  %p127_p10 = scmp.eq.s32.totalorder %s625_s19, 1 }
   0xe   : > { %p932_p9 = por %p121_p6, %p47_p1  ;;  %p681_p13 = scmp.lt.s32.totalorder %s851_s17, 2 }
   0xf   : > { %s937_s26 = scalar_select %p38_p7, %s839_s14, %s40_s21  }
  0x10   : > { %s1115_s25 = scalar_select %p932_p9, 1, 0 }
  0x11   : > { %p939_p11 = por %p127_p10, %p53_p3  ;;  %s153_s28 = sand.u32 1, %s839_s14  }
  0x12   : > { %s628_s29 = sshll.u32 %s153_s28, 5  ;;  %s653_s30 = sshll.u32 %s847_s16, 9 }
  0x13   : > { %s1116_s27 = scalar_select %p939_p11, 1, 0 }
  0x14   : > { %s950_s6 = scalar_lea.hbm %s1108_s0, %s653_s30  ;;  %s157_s7 = scalar_lea.vmem [#allocation2], %s628_s29 }
  0x15   : > { %s166_s8 = sshll.u32 %s157_s7, 4  ;;  %p956_p0 = pnand %p681_p13, %p922_p4  ;;  %s952_s8 = int_to_ptr.vmem [resolvable:$true] %s166_s8 }
  0x16   : > { %s961_s10 = scalar_lea.sflag [#allocation3], %s153_s28  ;;  %s739_s11 = scalar_lea.hbm %s950_s6, 512 }
  0x17   : > { %p740_p2 = scmp.ne.s32.totalorder %s950_s6, %s739_s11  ;;  %p741_p3 = pneg %p956_p0 }
  0x18   : > { %s744_s21 = scalar_lea.hbm %s1108_s0, 1024  ;;  %p745_p4 = scmp.lt.u32.totalorder %s950_s6, %s1108_s0 }
  0x19   : > { %p742_p5 = pnand %p741_p3, %p740_p2  ;;  %p746_p7 = scmp.lt.u32.totalorder %s744_s21, %s739_s11 }
  0x1a   : > { %p748_p13 = scmp.lt.u32.totalorder %s739_s11, %s950_s6 }
  0x1b   : > { %p743_p6 = pneg %p742_p5  ;;  %p747_p10 = por %p746_p7, %p745_p4 }
  0x1d   : > { %p749_p12 = por %p748_p13, %p747_p10 }
  0x1f   : > { %p750_p1 = pnand %p749_p12, %p743_p6 }
  0x21   : > { %753 = shalt.err (!%p750_p1)
}
  0x22   : > { %s754_s28 = scalar_lea.vmem %s952_s8, 512  ;;  %s853_s29 = smov [#allocation2]  }
  0x23   : > { %p755_p2 = scmp.ne.s32.totalorder %s952_s8, %s754_s28  ;;  %s759_s30 = sshll.u32 %s853_s29, 4  ;;  %s760_s30 = int_to_ptr.vmem [resolvable:$false] %s759_s30 }
  0x24   : > { %s761_s4 = scalar_lea.vmem %s760_s30, 1024  ;;  %p762_p9 = scmp.lt.s32.totalorder %s952_s8, %s760_s30 }
  0x25   : > { %p757_p5 = pnand %p755_p2, %p741_p3  ;;  %p763_p4 = scmp.lt.s32.totalorder %s761_s4, %s754_s28 }
  0x27   : > { %p758_p11 = pneg %p757_p5  ;;  %p764_p7 = por %p763_p4, %p762_p9 }
  0x29   : > { %p765_p10 = pnand %p764_p7, %p758_p11 }
  0x2b   : > { %768 = shalt.err (!%p765_p10)
}
  0x2c   : > { %s854_s5 = smov 256   ;;  %s855_s7 = smov 16  }
  0x2d   : > { %676 = dma.hbm_to_vmem [thread:$0]  (!%p956_p0), %s950_s6, 512, %s952_s8, %s961_s10, %s854_s5, %s854_s5, %s855_s7  }
  0x2e   : > { %p174_p12 = scmp.lt.s32.totalorder %s851_s17, 3  ;;  %p1118_p1 = scmp.ge.s32.totalorder %s851_s17, 1 }
  0x30   : > { %p175_p3 = pnand %p1118_p1, %p174_p12 }
  0x31   : > { %s993_s11 = sand.u32 (!%p175_p3), 1, %s835_s13  }
  0x32   : > { %178 = sbr.rel (%p175_p3) target bundleno = 749 (0x2ed), region = 32  ;;  %s632_s18 = sshll.u32 (!%p175_p3), %s993_s11, 5 }
  0x33   : > { %s181_s19 = scalar_lea.sflag (!%p175_p3), [#allocation3], %s993_s11  ;;  %s184_s21 = scalar_lea.vmem (!%p175_p3), [#allocation2], %s632_s18 }
  0x39   : > { %822 = dma.done.wait (%p928_p8), %s181_s19, 512  }
  0x3a   : > { %824 = vsyncadd (%p928_p8), %s181_s19, 4294966784  ;;  %v856_v0 = vmov 0.0   ;;  %v857_v1 = vmov 0   ;;  %v210_v2 = vld [vmem:[%s184_s21 + $0x8] sm:$0xff]  ;;  %v212_v3 = vld [vmem:[%s184_s21 + $0x18] sm:$0xff]  ;;  %vm227_vm0 = vcmask 130048  }
  0x3b   : > { %298 = vmatprep.mubr.f32.mxu0 %v856_v0  ;;  %304 = vmatprep.mubr.f32.mxu1 %v856_v0  ;;  %v209_v4 = vld [vmem:[%s184_s21] sm:$0xff]  ;;  %v655_v5 = vpack.c.bf16 %v212_v3, %v210_v2  ;;  %v211_v6 = vld [vmem:[%s184_s21 + $0x10] sm:$0xff]  ;;  %v214_v10 = vld [vmem:[%s1109_s1 + $0x8] sm:$0xff]  ;;  %s206_s30 = scalar_lea.vmem [#allocation5], %s632_s18  ;;  %s654_s5 = sshll.u32 %s843_s15, 9 }
  0x3c   : > { %737 = vset.pattern.permute.xlu0 %v857_v1  ;;  %738 = vset.pattern.permute.xlu1 %v857_v1  ;;  %v657_v7 = vpack.c.bf16 %v211_v6, %v209_v4  ;;  %v215_v8 = vld [vmem:[%s1110_s2] sm:$0xff]  ;;  %v216_v11 = vld [vmem:[%s1110_s2 + $0x8] sm:$0xff]  ;;  %v638_v13 = vld [vmem:[%s1110_s2 + $0x10] sm:$0xff]  ;;  %s537_s4 = sshll.u32 %s206_s30, 4  ;;  %s1059_s18 = scalar_lea.hbm %s1111_s3, %s654_s5  ;;  %s1054_s4 = int_to_ptr.vmem [resolvable:$true] %s537_s4 }
  0x3d   : > { %656 = vmatprep.subr.bf16.mxu0 %v655_v5  ;;  %667 = vmatprep.subr.bf16.mxu1 %v655_v5  ;;  %v213_v9 = vld [vmem:[%s1109_s1] sm:$0xff]  ;;  %v639_v14 = vld [vmem:[%s1110_s2 + $0x18] sm:$0xff]  ;;  %v645_v15 = vld [vmem:[%s1110_s2 + $0x28] sm:$0xff]  ;;  %s522_s15 = scalar_lea.sflag [#allocation4], %s993_s11  ;;  %s769_s21 = scalar_lea.vmem %s1054_s4, 512 }
  0x3e   : > { %658 = vmatpush1.bf16.msra.mxu0 %v657_v7  ;;  %668 = vmatpush1.bf16.msra.mxu1 %v657_v7  ;;  %v644_v12 = vld [vmem:[%s1110_s2 + $0x20] sm:$0xff]  ;;  %v636_v32 = vld [vmem:[%s1109_s1 + $0x10] sm:$0xff]  ;;  %v637_v33 = vld [vmem:[%s1109_s1 + $0x18] sm:$0xff]  ;;  %p770_p8 = scmp.ne.s32.totalorder %s1054_s4, %s769_s21  ;;  %p1119_p9 = scmp.ne.s32.totalorder %s1115_s25, 0 }
  0x3f   : > { %219 = vperm.xlu0 %737, %v215_v8   ;;  %323 = vperm.xlu1 %738, %v638_v13   ;;  %v642_v50 = vld [vmem:[%s1109_s1 + $0x20] sm:$0xff]  ;;  %v643_v51 = vld [vmem:[%s1109_s1 + $0x28] sm:$0xff]  ;;  %s858_s6 = smov [#allocation5]  }
  0x40   : > { %p771_p11 = pnand %p770_p8, %p1119_p9  ;;  %s773_s8 = sshll.u32 %s858_s6, 4  ;;  %s774_s8 = int_to_ptr.vmem [resolvable:$false] %s773_s8 }
  0x41   : > { %634 = vmatmul.mubr.msk.f32.vlgmr.msra.gmra.mrb[0].mxu0 %vm227_vm0, %v213_v9  ;;  %635 = vmatmul.mubr.msk.f32.vlgmr.msra.gmra.mrb[0].mxu1 %vm227_vm0, %v214_v10  ;;  %s775_s24 = scalar_lea.vmem %s774_s8, 1024  ;;  %p776_p6 = scmp.lt.s32.totalorder %s1054_s4, %s774_s8 }
  0x42   : > { %401 = vmatprep.mubr.f32.mxu1 %v856_v0  ;;  %504 = vmatprep.mubr.f32.mxu0 %v856_v0  ;;  %p772_p0 = pneg %p771_p11  ;;  %p777_p13 = scmp.lt.s32.totalorder %s775_s24, %s769_s21 }
  0x43   : > { %224 = vperm.xlu0 %737, %v216_v11   ;;  %328 = vperm.xlu1 %738, %v639_v14  }
  0x44   : > { %p778_p2 = por %p777_p13, %p776_p6 }
  0x46   : > { %p779_p5 = pnand %p778_p2, %p772_p0 }
  0x47   : > { %426 = vperm.xlu0 %737, %v644_v12   ;;  %431 = vperm.xlu1 %738, %v645_v15  }
  0xbe   : > { %v220_v16 = vpop.permute.xlu0 %219  ;;  %v324_v34 = vpop.permute.xlu1 %323 }
  0xc2   : > { %v225_v17 = vpop.permute.xlu0 %224  ;;  %v329_v38 = vpop.permute.xlu1 %328 }
  0xc6   : > { %v427_v52 = vpop.permute.xlu0 %426  ;;  %v432_v57 = vpop.permute.xlu1 %431 }
 0x114   : > { %v300_v18 = vpop.f32.mrb[0].mxu0  ;;  %v306_v19 = vpop.f32.mrb[0].mxu1 }
 0x115   : > { %v301_v20 = vadd.f32 %v300_v18, %v220_v16  ;;  %v307_v21 = vadd.f32 %v306_v19, %v225_v17  ;;  %v302_v22 = vpop.f32.mrb[1].mxu0  ;;  %v308_v23 = vpop.f32.mrb[1].mxu1 }
 0x116   : > { %v303_v24 = vadd.f32 %v302_v22, %v220_v16  ;;  %v309_v25 = vadd.f32 %v308_v23, %v225_v17 }
 0x117   : > { %v311_v26 = vmax.f32 %v301_v20, 0.0  ;;  %v313_v27 = vmax.f32 %v307_v21, 0.0 }
 0x118   : > { %v312_v28 = vmax.f32 %v303_v24, 0.0  ;;  %v314_v29 = vmax.f32 %v309_v25, 0.0 }
 0x119   : > { %v661_v30 = vpack.c.bf16 %v313_v27, %v311_v26 }
 0x11a   : > { %v659_v31 = vpack.c.bf16 %v314_v29, %v312_v28 }
 0x11c   : > { %660 = vmatprep.subr.bf16.mxu1 %v659_v31 }
 0x11d   : > { %662 = vmatpush1.bf16.msra.mxu1 %v661_v30 }
 0x120   : > { %640 = vmatmul.mubr.msk.f32.vlgmr.msra.gmra.mrb[2].mxu1 %vm227_vm0, %v636_v32 }
 0x121   : > { %407 = vmatprep.mubr.f32.mxu1 %v856_v0 }
 0x124   : > { %641 = vmatmul.mubr.msk.f32.gmra.mrb[4].mxu1 %vm227_vm0, %v637_v33 }
 0x1f3   : > { %v403_v35 = vpop.f32.mrb[2].mxu1 }
 0x1f4   : > { %v405_v36 = vpop.f32.mrb[3].mxu1  ;;  %v404_v37 = vadd.f32 %v403_v35, %v324_v34 }
 0x1f5   : > { %v406_v39 = vadd.f32 %v405_v36, %v324_v34 }
 0x1f6   : > { %v414_v44 = vmax.f32 %v404_v37, 0.0 }
 0x1f7   : > { %v409_v40 = vpop.f32.mrb[4].mxu1  ;;  %v415_v46 = vmax.f32 %v406_v39, 0.0 }
 0x1f8   : > { %v410_v41 = vadd.f32 %v409_v40, %v329_v38  ;;  %v411_v42 = vpop.f32.mrb[5].mxu1 }
 0x1f9   : > { %v412_v43 = vadd.f32 %v411_v42, %v329_v38 }
 0x1fa   : > { %v416_v45 = vmax.f32 %v410_v41, 0.0 }
 0x1fb   : > { %v417_v47 = vmax.f32 %v412_v43, 0.0 }
 0x1fc   : > { %v665_v48 = vpack.c.bf16 %v416_v45, %v414_v44 }
 0x1fd   : > { %v663_v49 = vpack.c.bf16 %v417_v47, %v415_v46 }
 0x1ff   : > { %664 = vmatprep.subr.bf16.mxu0 %v663_v49 }
 0x200   : > { %666 = vmatpush1.bf16.msra.mxu0 %v665_v48 }
 0x203   : > { %646 = vmatmul.mubr.msk.f32.vlgmr.msra.gmra.mrb[2].mxu0 %vm227_vm0, %v642_v50 }
 0x204   : > { %510 = vmatprep.mubr.f32.mxu0 %v856_v0 }
 0x207   : > { %647 = vmatmul.mubr.msk.f32.gmra.mrb[4].mxu0 %vm227_vm0, %v643_v51 }
 0x2d6   : > { %v506_v53 = vpop.f32.mrb[2].mxu0 }
 0x2d7   : > { %v507_v54 = vadd.f32 %v506_v53, %v427_v52  ;;  %v508_v55 = vpop.f32.mrb[3].mxu0 }
 0x2d8   : > { %v509_v56 = vadd.f32 %v508_v55, %v427_v52 }
 0x2d9   : > { %517 = vst [vmem:[%s206_s30] sm:$0xff] %v507_v54 }
 0x2da   : > { %518 = vst [vmem:[%s206_s30 + $0x8] sm:$0xff] %v509_v56  ;;  %v512_v58 = vpop.f32.mrb[4].mxu0 }
 0x2db   : > { %v513_v59 = vadd.f32 %v512_v58, %v432_v57  ;;  %v514_v60 = vpop.f32.mrb[5].mxu0 }
 0x2dc   : > { %v515_v61 = vadd.f32 %v514_v60, %v432_v57 }
 0x2dd   : > { %519 = vst [vmem:[%s206_s30 + $0x10] sm:$0xff] %v513_v59 }
 0x2de   : > { %520 = vst [vmem:[%s206_s30 + $0x18] sm:$0xff] %v515_v61 }
 0x2df   : > { %782 = shalt.err (!%p779_p5)
}
 0x2e0   : > { %s783_s9 = scalar_lea.hbm %s1059_s18, 512  ;;  %s787_s23 = scalar_lea.hbm %s1111_s3, 1024 }
 0x2e1   : > { %p784_p4 = scmp.ne.s32.totalorder %s1059_s18, %s783_s9  ;;  %p788_p12 = scmp.lt.u32.totalorder %s1059_s18, %s1111_s3 }
 0x2e2   : > { %p789_p1 = scmp.lt.u32.totalorder %s787_s23, %s783_s9  ;;  %p791_p8 = scmp.lt.u32.totalorder %s783_s9, %s1059_s18 }
 0x2e3   : > { %p785_p7 = pnand %p784_p4, %p1119_p9 }
 0x2e4   : > { %p790_p3 = por %p789_p1, %p788_p12 }
 0x2e5   : > { %p786_p10 = pneg %p785_p7 }
 0x2e6   : > { %p792_p11 = por %p791_p8, %p790_p3 }
 0x2e8   : > { %p793_p0 = pnand %p792_p11, %p786_p10 }
 0x2ea   : > { %796 = shalt.err (!%p793_p0)
}
 0x2eb   : > { %s859_s30 = smov 256   ;;  %s860_s5 = smov 16  }
 0x2ec   : > { %671 = dma.vmem_to_hbm [thread:$0]  (%p1119_p9), %s1054_s4, 512, %s1059_s18, %s522_s15, %s859_s30, %s859_s30, %s860_s5  }
 0x2ed PF: > { %s552_s7 = sand.u32 1, %s831_s12   ;;  %p1120_p6 = scmp.ne.s32.totalorder %s1116_s27, 0 }
 0x2ee   : > { %p1121_p13 = scmp.ge.s32.totalorder %s851_s17, 2  ;;  %s553_s19 = scalar_lea.sflag [#allocation4], %s552_s7 }
 0x2f0   : > { %p678_p2 = pnand %p1121_p13, %p1120_p6 }
 0x2f2   : > { %826 = dma.done.wait (!%p678_p2), %s553_s19, 512  }
 0x2f3   : > { %828 = vsyncadd (!%p678_p2), %s553_s19, 4294966784  ;;  %s19_s17 = sadd.s32 1, %s851_s17   ;;  %s1122_s12 = smov %s835_s13 }
 0x2f4   : > { %p16_p5 = scmp.ge.s32.totalorder %s19_s17, 4   ;;  %s1123_s13 = smov %s839_s14 }
 0x2f5   : > { %s1124_s14 = smov %s937_s26  ;;  %s1125_s15 = smov %s847_s16 }
 0x2f6   : > { %s1126_s16 = smov %s1128_s20  ;;  %18 = sbr.rel (!%p16_p5) target bundleno = 6 (0x6), region = 81 }
 0x2fd   :  { %558 = vsyncpa [#allocation3], 1 }
 0x2fe   :  { %560 = vsyncpa [#allocation3 + $0x1], 1 }
 0x2ff   :  { %561 = vsyncpa [#allocation4], 1 }
 0x300   :  { %563 = vsyncpa [#allocation4 + $0x1], 1 }

</bundles_post_ra>
